<compile_context>
chip_gen: v5e
topology: v5e:2x2
jax: 0.10.0
libtpu: 0.0.40
codegen_flags: <defaults>
</compile_context>

<pallas_src>
import functools
from typing import Callable, Optional

import jax
import jax.numpy as jnp
from jax import lax
from jax.experimental import pallas as pl
from jax.experimental.pallas import tpu as pltpu


def _round_up(x: int, m: int) -> int:
    return ((x + m - 1) // m) * m


@functools.lru_cache(maxsize=None)
def _device_info():
    """(tensorcores_per_chip, x-block byte budget, vmem_limit_bytes)."""
    kind = ""
    try:
        kind = jax.devices()[0].device_kind.lower()
    except Exception:  # pragma: no cover - defensive
        pass
    if ("v7" in kind) or ("7x" in kind):
        # v7x: 2 TCs/chip, ~3.2 TB/s HBM -> bigger blocks; 64 MiB VMEM per TC.
        return 2, 16 * 1024 * 1024, 48 * 1024 * 1024
    # v5e / v6e (single TC). 8 MiB blocks are already past the amortization
    # plateau at their HBM rates; 32 MiB scoped VMEM is safe on both.
    return 1, 8 * 1024 * 1024, 32 * 1024 * 1024


def _choose_tiles(n: int, g: int, itemsize: int, block_budget_bytes: int,
                  num_cores: int):
    """Pick (tn, tg, chunk): big, lane-contiguous, VMEM-safe x blocks."""
    sub = 8 * max(1, 4 // itemsize)  # sublane granularity (8 f32 / 16 bf16 / 32 i8)
    g_lanes = _round_up(g, 128)
    max_tg = max((block_budget_bytes // (sub * itemsize)) // 128, 1) * 128
    max_tg = min(max_tg, 32768)  # keep per-chunk f32 intermediates bounded
    tg = min(g_lanes, max_tg)
    # Split the gene axis ONLY on 2-TensorCore chips (v7x), where the
    # "parallel" gi axis actually shards across cores. On v5e/v6e keep tg == G
    # so each x-block row DMA stays one fully contiguous transfer. Require an
    # even 2x128-aligned split so no partial gi block interacts with aliasing.
    if num_cores >= 2 and tg == g_lanes and g >= 2048 and g % 256 == 0:
        tg = g // 2
    if tg >= g:
        tg = g  # full-extent lane block: always legal, fully contiguous rows
    max_tn = max((block_budget_bytes // (tg * itemsize)) // sub, 1) * sub
    tn = min(_round_up(n, sub), max_tn)  # no artificial cap: fill the budget
    if tn >= n:
        tn = n  # full-extent sublane block: always legal
    # Row-chunk size for in-kernel accumulation: bounds the widened f32 x and
    # x*x intermediates to ~2 MiB each regardless of the input dtype.
    chunk_cap = max(sub, ((2 * 1024 * 1024) // max(tg * 4, 1)) // sub * sub)
    chunk = max(1, min(512, chunk_cap, tn))
    return tn, tg, chunk


# ----------------------------------------------------------------------------
# Kernel: accumulate running sums / squared sums over the batch (N) axis.
# Grid = (gi, ni); ni is the reduction axis (last, "arbitrary"); the [1, tg]
# output blocks stay resident across ni (accumulator pattern, seeded at ni==0
# from the previous running state, which is aliased into the outputs).
# ----------------------------------------------------------------------------
def _make_accumulate_kernel(n_total: int, tn: int, chunk: int):
    needs_row_mask = (n_total % tn) != 0  # only the edge ni block has OOB rows
    n_full = tn // chunk
    rem = tn - n_full * chunk
    unroll = bool(n_full <= 8)

    def kernel(x_ref, prev_sums_ref, prev_sq_ref, sums_ref, sq_ref):
        ni = pl.program_id(1)

        @pl.when(ni == 0)
        def _seed():
            sums_ref[...] = prev_sums_ref[...]
            sq_ref[...] = prev_sq_ref[...]

        def partial(start, rows, masked, s_acc, q_acc):
            x = x_ref[pl.ds(start, rows), :].astype(jnp.float32)
            if masked:
                # (rows, 1) iota; jnp.where broadcasts it across the lanes.
                row = lax.broadcasted_iota(jnp.int32, (rows, 1), 0) + ni * tn + start
                x = jnp.where(row < n_total, x, 0.0)
            s_acc = s_acc + jnp.sum(x, axis=0, keepdims=True)
            q_acc = q_acc + jnp.sum(x * x, axis=0, keepdims=True)
            return s_acc, q_acc

        def accumulate(masked):
            def body(c, carry):
                s_acc, q_acc = carry
                start = pl.multiple_of(c * chunk, chunk)
                return partial(start, chunk, masked, s_acc, q_acc)

            init = (jnp.zeros(sums_ref.shape, jnp.float32),
                    jnp.zeros(sq_ref.shape, jnp.float32))
            s_acc, q_acc = lax.fori_loop(0, n_full, body, init, unroll=unroll)
            if rem:
                s_acc, q_acc = partial(n_full * chunk, rem, masked, s_acc, q_acc)
            sums_ref[...] += s_acc
            sq_ref[...] += q_acc

        if needs_row_mask:
            last = pl.num_programs(1) - 1

            @pl.when(ni == last)   # masked path only on the edge block
            def _edge():
                accumulate(True)

            @pl.when(ni != last)   # unmasked fast path everywhere else
            def _bulk():
                accumulate(False)
        else:
            accumulate(False)

    return kernel


@functools.lru_cache(maxsize=None)
def _build_accumulate_call(n: int, g: int, itemsize: int, num_cores: int,
                           block_budget_bytes: int, vmem_limit_bytes: int):
    tn, tg, chunk = _choose_tiles(n, g, itemsize, block_budget_bytes, num_cores)
    grid = (pl.cdiv(g, tg), pl.cdiv(n, tn))

    call = pl.pallas_call(
        _make_accumulate_kernel(n, tn, chunk),
        out_shape=(
            jax.ShapeDtypeStruct((1, g), jnp.float32),
            jax.ShapeDtypeStruct((1, g), jnp.float32),
        ),
        grid_spec=pltpu.PrefetchScalarGridSpec(
            num_scalar_prefetch=0,
            grid=grid,
            in_specs=[
                pl.BlockSpec((tn, tg), lambda gi, ni: (ni, gi)),
                pl.BlockSpec((1, tg), lambda gi, ni: (0, gi)),
                pl.BlockSpec((1, tg), lambda gi, ni: (0, gi)),
            ],
            out_specs=[
                pl.BlockSpec((1, tg), lambda gi, ni: (0, gi)),
                pl.BlockSpec((1, tg), lambda gi, ni: (0, gi)),
            ],
        ),
        # Update the running state in place (prev_sums -> sums, prev_sq -> sq).
        input_output_aliases={1: 0, 2: 1},
        compiler_params=pltpu.CompilerParams(
            dimension_semantics=("parallel", "arbitrary"),
            vmem_limit_bytes=vmem_limit_bytes,
        ),
    )
    return jax.jit(call)  # one compile per (shape, dtype), cached here


def accumulate_sums(x_ng, prev_sums, prev_sq):
    """x_ng: [N, G] (any float dtype); prev_sums/prev_sq: [1, G] float32."""
    n, g = x_ng.shape
    num_cores, block_budget, vmem_limit = _device_info()
    fn = _build_accumulate_call(n, g, x_ng.dtype.itemsize, num_cores,
                                block_budget, vmem_limit)
    return fn(x_ng, prev_sums, prev_sq)


# ----------------------------------------------------------------------------
# Module wrapper mirroring scvid.module.OnePassMeanVarStd semantics.
# ----------------------------------------------------------------------------
class OnePassMeanVarStd:
    def __init__(self, transform: Optional[Callable] = None) -> None:
        self.transform = transform
        self.x_sums = None          # [1, G] float32 once initialized
        self.x_squared_sums = None  # [1, G] float32
        self.x_size = 0             # host-side Python int, like the torch module
        self._stats_cache = None
        self._row_buckets = []      # compiled row-count buckets (recompile avoidance)

    def _bucket_rows(self, n: int) -> int:
        # Reuse an existing bucket (pad the short batch with zero rows) when the
        # padding overhead stays <= 2x; otherwise register a new bucket. Steady
        # state (fixed batch size) pays zero padding and compiles once; the
        # smaller last batch of an epoch reuses the same compiled kernel.
        for b in self._row_buckets:
            if n <= b <= 2 * n:
                return b
        b = _round_up(n, 8)
        self._row_buckets.append(b)
        self._row_buckets.sort()
        return b

    def forward(self, x_ng):
        if self.transform is not None:
            x_ng = self.transform(x_ng)
        n, g = x_ng.shape
        if self.x_sums is None:
            self.x_sums = jnp.zeros((1, g), jnp.float32)
            self.x_squared_sums = jnp.zeros((1, g), jnp.float32)
        n_pad = self._bucket_rows(n)
        if n_pad != n:
            # Zero rows contribute nothing to either running sum (pad AFTER the
            # transform so that stays true).
            pad = jnp.zeros((n_pad - n, g), x_ng.dtype)
            x_ng = jnp.concatenate([x_ng, pad], axis=0)
        # NOTE: no wrapper-side f32 upcast; the kernel casts per row chunk.
        self.x_sums, self.x_squared_sums = accumulate_sums(
            x_ng, self.x_sums, self.x_squared_sums
        )
        self.x_size += n
        self._stats_cache = None
        return None  # matches torch forward returning None

    __call__ = forward

    def _stats(self):
        if self._stats_cache is None:
            # Tiny [1, G] elementwise math: plain jnp (XLA fuses it); a
            # pallas_call here would be pure launch overhead.
            # TODO(synk): E[x^2]-E[x]^2 in f32 matches the torch reference but
            # can lose precision for |mean| >> std; a shifted/Welford merge
            # would be more robust if accuracy ever matters.
            inv_n = 1.0 / float(self.x_size)
            mean = self.x_sums[0] * inv_n
            var = jnp.maximum(self.x_squared_sums[0] * inv_n - mean * mean, 0.0)
            std = jnp.sqrt(var)
            self._stats_cache = (mean, var, std)
        return self._stats_cache

    @property
    def mean(self):
        return self._stats()[0]

    @property
    def var(self):
        return self._stats()[1]

    @property
    def std(self):
        return self._stats()[2]


if __name__ == "__main__":
    key = jax.random.PRNGKey(0)
    G = 256
    k1, k2 = jax.random.split(key)
    x1 = jax.random.normal(k1, (8, G), dtype=jnp.float32) * 2.0 + 1.0   # batch 1
    x2 = jax.random.normal(k2, (5, G), dtype=jnp.float32) * 0.5 - 3.0   # batch 2 (odd size)

    module = OnePassMeanVarStd(transform=None)
    module.forward(x1)
    module.forward(x2)

    mean = jax.block_until_ready(module.mean)
    var = jax.block_until_ready(module.var)
    std = jax.block_until_ready(module.std)

    # reference (plain JAX) check of one-pass semantics
    x_all = jnp.concatenate([x1, x2], axis=0)
    n_tot = x_all.shape[0]
    ref_mean = x_all.sum(axis=0) / n_tot
    ref_var = (x_all ** 2).sum(axis=0) / n_tot - ref_mean ** 2
    ref_std = jnp.sqrt(jnp.maximum(ref_var, 0.0))

    assert mean.shape == (G,) and var.shape == (G,) and std.shape == (G,)
    assert jnp.allclose(mean, ref_mean, atol=1e-4, rtol=1e-4)
    assert jnp.allclose(var, ref_var, atol=1e-4, rtol=1e-4)
    assert jnp.allclose(std, ref_std, atol=1e-4, rtol=1e-4)

    print("KERNEL_OK")
</pallas_src>

<mosaic_0001>
module attributes {stable_mosaic.version = 11 : i64} {
  func.func @kernel(%arg0: i32, %arg1: i32, %arg2: memref<8x256xf32, #tpu.memory_space<vmem>>, %arg3: memref<1x256xf32, #tpu.memory_space<vmem>>, %arg4: memref<1x256xf32, #tpu.memory_space<vmem>>, %arg5: memref<1x256xf32, #tpu.memory_space<vmem>>, %arg6: memref<1x256xf32, #tpu.memory_space<vmem>>) attributes {dimension_semantics = [#tpu.dimension_semantics<parallel>, #tpu.dimension_semantics<arbitrary>], iteration_bounds = array<i64: 1, 1>, scalar_prefetch = 0 : i64, scratch_operands = 0 : i64, tpu.core_type = #tpu.core_type<tc>, window_params = [{transform_indices = @transform_0, window_bounds = array<i64: 8, 256>}, {transform_indices = @transform_1, window_bounds = array<i64: 1, 256>}, {transform_indices = @transform_2, window_bounds = array<i64: 1, 256>}, {transform_indices = @transform_3, window_bounds = array<i64: 1, 256>}, {transform_indices = @transform_4, window_bounds = array<i64: 1, 256>}]} {
    %c0_i32 = arith.constant 0 : i32
    %0 = arith.cmpi eq, %arg1, %c0_i32 : i32
    %1 = arith.extui %0 : i1 to i32
    %c0_i32_0 = arith.constant 0 : i32
    %2 = arith.cmpi ne, %1, %c0_i32_0 : i32
    scf.if %2 {
      %c0_13 = arith.constant 0 : index
      %c0_14 = arith.constant 0 : index
      %22 = vector.load %arg3[%c0_13, %c0_14] : memref<1x256xf32, #tpu.memory_space<vmem>>, vector<1x256xf32>
      %c0_15 = arith.constant 0 : index
      %c0_16 = arith.constant 0 : index
      %23 = vector.load %arg5[%c0_15, %c0_16] : memref<1x256xf32, #tpu.memory_space<vmem>>, vector<1x256xf32>
      tpu.vector_store %arg5[%c0_15, %c0_16], %22 {strides = array<i32>} : memref<1x256xf32, #tpu.memory_space<vmem>>, vector<1x256xf32>,
      %c0_17 = arith.constant 0 : index
      %c0_18 = arith.constant 0 : index
      %24 = vector.load %arg4[%c0_17, %c0_18] : memref<1x256xf32, #tpu.memory_space<vmem>>, vector<1x256xf32>
      %c0_19 = arith.constant 0 : index
      %c0_20 = arith.constant 0 : index
      %25 = vector.load %arg6[%c0_19, %c0_20] : memref<1x256xf32, #tpu.memory_space<vmem>>, vector<1x256xf32>
      tpu.vector_store %arg6[%c0_19, %c0_20], %24 {strides = array<i32>} : memref<1x256xf32, #tpu.memory_space<vmem>>, vector<1x256xf32>,
    } else {
    }
    %cst = arith.constant 0.000000e+00 : f32
    %3 = vector.broadcast %cst : f32 to vector<1x256xf32>
    %cst_1 = arith.constant 0.000000e+00 : f32
    %4 = vector.broadcast %cst_1 : f32 to vector<1x256xf32>
    %c0_i32_2 = arith.constant 0 : i32
    %c8_i32 = arith.constant 8 : i32
    %5 = arith.muli %c0_i32_2, %c8_i32 : i32
    %6 = tpu.assume_multiple %5, 8 : i32
    %7 = arith.index_cast %6 : i32 to index
    %c0 = arith.constant 0 : index
    %8 = vector.load %arg2[%7, %c0] : memref<8x256xf32, #tpu.memory_space<vmem>>, vector<8x256xf32>
    %cst_3 = arith.constant dense<0.000000e+00> : vector<256xf32>
    %9 = vector.multi_reduction <add>, %8, %cst_3 [0] : vector<8x256xf32> to vector<256xf32>
    %10 = vector.shape_cast %9 : vector<256xf32> to vector<1x256xf32>
    %11 = arith.addf %3, %10 : vector<1x256xf32>
    %12 = arith.mulf %8, %8 : vector<8x256xf32>
    %cst_4 = arith.constant dense<0.000000e+00> : vector<256xf32>
    %13 = vector.multi_reduction <add>, %12, %cst_4 [0] : vector<8x256xf32> to vector<256xf32>
    %14 = vector.shape_cast %13 : vector<256xf32> to vector<1x256xf32>
    %15 = arith.addf %4, %14 : vector<1x256xf32>
    %c1_i32 = arith.constant 1 : i32
    %c0_5 = arith.constant 0 : index
    %c0_6 = arith.constant 0 : index
    %16 = vector.load %arg5[%c0_5, %c0_6] : memref<1x256xf32, #tpu.memory_space<vmem>>, vector<1x256xf32>
    %17 = arith.addf %16, %11 : vector<1x256xf32>
    %c0_7 = arith.constant 0 : index
    %c0_8 = arith.constant 0 : index
    %18 = vector.load %arg5[%c0_7, %c0_8] : memref<1x256xf32, #tpu.memory_space<vmem>>, vector<1x256xf32>
    tpu.vector_store %arg5[%c0_7, %c0_8], %17 {strides = array<i32>} : memref<1x256xf32, #tpu.memory_space<vmem>>, vector<1x256xf32>,
    %c0_9 = arith.constant 0 : index
    %c0_10 = arith.constant 0 : index
    %19 = vector.load %arg6[%c0_9, %c0_10] : memref<1x256xf32, #tpu.memory_space<vmem>>, vector<1x256xf32>
    %20 = arith.addf %19, %15 : vector<1x256xf32>
    %c0_11 = arith.constant 0 : index
    %c0_12 = arith.constant 0 : index
    %21 = vector.load %arg6[%c0_11, %c0_12] : memref<1x256xf32, #tpu.memory_space<vmem>>, vector<1x256xf32>
    tpu.vector_store %arg6[%c0_11, %c0_12], %20 {strides = array<i32>} : memref<1x256xf32, #tpu.memory_space<vmem>>, vector<1x256xf32>,
    return
  }
  func.func @transform_0(%arg0: i32, %arg1: i32) -> (i32, i32) {
    %c0_i32 = arith.constant 0 : i32
    return %arg1, %arg0 : i32, i32
  }
  func.func @transform_1(%arg0: i32, %arg1: i32) -> (i32, i32) {
    %c0_i32 = arith.constant 0 : i32
    %c0_i32_0 = arith.constant 0 : i32
    return %c0_i32, %arg0 : i32, i32
  }
  func.func @transform_2(%arg0: i32, %arg1: i32) -> (i32, i32) {
    %c0_i32 = arith.constant 0 : i32
    %c0_i32_0 = arith.constant 0 : i32
    return %c0_i32, %arg0 : i32, i32
  }
  func.func @transform_3(%arg0: i32, %arg1: i32) -> (i32, i32) {
    %c0_i32 = arith.constant 0 : i32
    %c0_i32_0 = arith.constant 0 : i32
    return %c0_i32, %arg0 : i32, i32
  }
  func.func @transform_4(%arg0: i32, %arg1: i32) -> (i32, i32) {
    %c0_i32 = arith.constant 0 : i32
    %c0_i32_0 = arith.constant 0 : i32
    return %c0_i32, %arg0 : i32, i32
  }
}

</mosaic_0001>

<bundles_post_ra>
// kernel: tpu_custom_call.1
= control target key start
LH: loop header
LB: loop body
LE: loop exit
PB: predicated region body
PF: predicated region fallthrough
CT: control target
= control target key end

     0   :  { %10 = vsyncpa [#allocation3], 0  ;;  %s353_s0 = inlined_call_operand.hbm [shape: f32[8,256], index: 0, kind: input, shape index: {}]   ;;  %s354_s1 = inlined_call_operand.hbm [shape: f32[1,256], index: 1, kind: input, shape index: {}, may-alias: {1,3}]   ;;  %s355_s2 = inlined_call_operand.hbm [shape: f32[1,256], index: 2, kind: input, shape index: {}, may-alias: {2,4}]   ;;  %s356_s3 = inlined_call_operand.hbm [shape: f32[1,256], index: 3, kind: output, shape index: {0}, may-alias: {1,3}]   ;;  %s357_s4 = inlined_call_operand.hbm [shape: f32[1,256], index: 4, kind: output, shape index: {1}, may-alias: {2,4}]  }
   0x1   :  { %11 = vsyncpa [#allocation6], 0 }
   0x2   :  { %12 = vsyncpa [#allocation4], 0  ;;  %s30_s17 = sshll.u32 %s354_s1, 4  ;;  %s31_s17 = int_to_ptr.hbm [resolvable:$true] %s30_s17 }
   0x3   :  { %13 = vsyncpa [#allocation10], 0  ;;  %s294_s18 = smov [#allocation5]   ;;  %s19_s22 = sshll.u32 %s353_s0, 4  ;;  %s20_s22 = int_to_ptr.hbm [resolvable:$true] %s19_s22 }
   0x4   :  { %s32_s19 = sshll.u32 %s294_s18, 4  ;;  %s295_s23 = smov [#allocation2]   ;;  %s33_s19 = int_to_ptr.vmem [resolvable:$true] %s32_s19 }
   0x5   :  { %35 = dma.hbm_to_vmem [thread:$0]  %s31_s17, 32, %s33_s19, [#allocation6]  }
   0x6   :  { %s21_s24 = sshll.u32 %s295_s23, 4  ;;  %s41_s27 = sshll.u32 %s355_s2, 4  ;;  %s22_s24 = int_to_ptr.vmem [resolvable:$true] %s21_s24  ;;  %s42_s27 = int_to_ptr.hbm [resolvable:$true] %s41_s27 }
   0x7   :  { %24 = dma.hbm_to_vmem [thread:$0]  %s20_s22, 256, %s22_s24, [#allocation3]  }
   0x8   :  { %s296_s1 = smov [#allocation7]  }
   0x9   :  { %s43_s28 = sshll.u32 %s296_s1, 4  ;;  %s44_s28 = int_to_ptr.vmem [resolvable:$true] %s43_s28 }
   0xa   :  { %46 = dma.hbm_to_vmem [thread:$0]  %s42_s27, 32, %s44_s28, [#allocation6]  }
   0xb   :  { %286 = dma.done.wait [#allocation3], 256  }
   0xc   :  { %287 = vsyncadd [#allocation3], 4294967040 }
   0xd   :  { %288 = dma.done.wait [#allocation6], 64  }
   0xe   :  { %289 = vsyncadd [#allocation6], 4294967232  ;;  %v64_v0 = vlaneseq  ;;  %v63_v2 = vld [vmem:[#allocation5] sm:$0x3]  ;;  %v69_v3 = vld [vmem:[#allocation7] sm:$0x3] }
   0xf   :  { %v74_v4 = vld [vmem:[#allocation2] sm:$0xff]  ;;  %v75_v5 = vld [vmem:[#allocation2 + $0x8] sm:$0xff]  ;;  %vm110_vm1 = vcmask 1040384   ;;  %s297_s0 = smov [#allocation8]   ;;  %s134_s5 = sshll.u32 %s356_s3, 4  ;;  %s135_s5 = int_to_ptr.hbm [resolvable:$true] %s134_s5 }
  0x10   :  { %vm333_vm0 = vcmp.lt.s32.totalorder %v64_v0, 256  ;;  %v76_v6 = vrot.slane %v74_v4, 4  ;;  %v90_v7 = vmul.f32 %v74_v4, %v74_v4  ;;  %v82_v8 = vrot.slane %v75_v5, 4  ;;  %s132_s2 = sshll.u32 %s297_s0, 4  ;;  %s298_s6 = smov [#allocation9]   ;;  %s133_s2 = int_to_ptr.vmem [resolvable:$true] %s132_s2 }
  0x11   :  { %68 = vst.msk [vmem:[#allocation8] sm:$0x3] %vm333_vm0, %v63_v2  ;;  %v91_v9 = vmul.f32 %v75_v5, %v75_v5  ;;  %s143_s7 = sshll.u32 %s298_s6, 4  ;;  %s145_s10 = sshll.u32 %s357_s4, 4  ;;  %s144_s7 = int_to_ptr.vmem [resolvable:$true] %s143_s7  ;;  %s146_s10 = int_to_ptr.hbm [resolvable:$true] %s145_s10 }
  0x12   :  { %70 = vst.msk [vmem:[#allocation9] sm:$0x3] %vm333_vm0, %v69_v3  ;;  %v77_v10 = vadd.f32 %v76_v6, %v74_v4  ;;  %v92_v11 = vrot.slane %v90_v7, 4  ;;  %v83_v12 = vadd.f32 %v82_v8, %v75_v5 }
  0x13   :  { %v98_v13 = vrot.slane %v91_v9, 4 }
  0x14   :  { %v78_v14 = vrot.slane %v77_v10, 2  ;;  %v93_v15 = vadd.f32 %v92_v11, %v90_v7  ;;  %v84_v16 = vrot.slane %v83_v12, 2 }
  0x15   :  { %v99_v17 = vadd.f32 %v98_v13, %v91_v9 }
  0x16   :  { %v79_v18 = vadd.f32 %v78_v14, %v77_v10  ;;  %v94_v19 = vrot.slane %v93_v15, 2  ;;  %v85_v20 = vadd.f32 %v84_v16, %v83_v12 }
  0x17   :  { %v100_v21 = vrot.slane %v99_v17, 2 }
  0x18   :  { %v80_v22 = vrot.slane %v79_v18, 1  ;;  %v95_v23 = vadd.f32 %v94_v19, %v93_v15  ;;  %v86_v24 = vrot.slane %v85_v20, 1  ;;  %v106_v30 = vld [vmem:[#allocation8] sm:$0x3] }
  0x19   :  { %v101_v25 = vadd.f32 %v100_v21, %v99_v17  ;;  %v119_v35 = vld [vmem:[#allocation9] sm:$0x3] }
  0x1a   :  { %v96_v26 = vrot.slane %v95_v23, 1  ;;  %v81_v27 = vadd.f32 %v80_v22, %v79_v18  ;;  %v87_v28 = vadd.f32 %v86_v24, %v85_v20 }
  0x1b   :  { %v102_v29 = vrot.slane %v101_v25, 1 }
  0x1c   :  { %v109_v31 = vrot.slane %v87_v28, 7  ;;  %v97_v32 = vadd.f32 %v96_v26, %v95_v23 }
  0x1d   :  { %v103_v33 = vadd.f32 %v102_v29, %v101_v25 }
  0x1e   :  { %v111_v34 = vsel %vm110_vm1, %v81_v27, %v109_v31 }
  0x1f   :  { %v122_v36 = vrot.slane %v103_v33, 7  ;;  %v113_v37 = vadd.f32 %v111_v34, %v106_v30 }
  0x21   :  { %v123_v38 = vsel %vm110_vm1, %v97_v32, %v122_v36  ;;  %118 = vst.msk [vmem:[#allocation8] sm:$0x3] %vm333_vm0, %v113_v37 }
  0x22   :  { %v125_v39 = vadd.f32 %v123_v38, %v119_v35  ;;  %137 = dma.vmem_to_hbm [thread:$0]  %s133_s2, 32, %s135_s5, [#allocation4]  }
  0x24   :  { %126 = vst.msk [vmem:[#allocation9] sm:$0x3] %vm333_vm0, %v125_v39 }
  0x25   :  { %148 = dma.vmem_to_hbm [thread:$0]  %s144_s7, 32, %s146_s10, [#allocation10]  }
  0x26   :  { %290 = dma.done.wait [#allocation4], 32  }
  0x27   :  { %291 = vsyncadd [#allocation4], 4294967264 }
  0x28   :  { %292 = dma.done.wait [#allocation10], 32  }
  0x29   :  { %293 = vsyncadd [#allocation10], 4294967264 }
  0x2a   :  { %157 = vsyncpa [#allocation3], 1 }
  0x2b   :  { %158 = vsyncpa [#allocation6], 1 }
  0x2c   :  { %159 = vsyncpa [#allocation4], 1 }
  0x2d   :  { %160 = vsyncpa [#allocation10], 1 }

</bundles_post_ra>
